<compile_context>
chip_gen: v5e
topology: v5e:2x2
jax: 0.10.0
libtpu: 0.0.40
codegen_flags: <defaults>
</compile_context>

<pallas_src>
import jax
import jax.numpy as jnp
from jax.experimental import pallas as pl
from jax.experimental.pallas import tpu as pltpu

LANE = 128              # lane width of a vreg
MAX_TILE_ROWS = 4096    # 4096 x 128 f32 = 2 MiB per block
SINGLE_BLOCK_ROWS = 512 # <= 256 KiB of data: one block, no pipelining overhead
TARGET_MIN_BLOCKS = 4   # v7x megacore: >= 2 blocks per TensorCore


def _linear_kernel(w_ref, b_ref, x_ref, o_ref):
    # Scalar FMA on the VPU: y = x * w + b (w, b read from SMEM as scalars).
    w = w_ref[0, 0]
    b = b_ref[0, 0]
    o_ref[...] = x_ref[...] * w + b


def _choose_tile_rows(rows: int) -> int:
    """Pick the per-block row count (multiple of 8, capped at 2 MiB blocks)."""
    if rows <= SINGLE_BLOCK_ROWS:
        # Tiny input: single full-array block (full-dim exception to (8,128)).
        return rows
    tile = min(MAX_TILE_ROWS, pl.cdiv(rows, TARGET_MIN_BLOCKS))
    return max(8, (tile // 8) * 8)


def linear_forward(x, weight, bias):
    """Forward of torch.nn.Linear(1, 1).

    x: (N, 1) f32, weight: (1, 1) f32, bias: (1,) f32 -> (N, 1) f32.
    """
    n, in_f = x.shape
    out_f, _ = weight.shape
    assert in_f == 1 and out_f == 1, "kernel is specialized to Linear(1, 1)"

    # ---- wrapper-side re-layout: make the batch dimension lane-dense ----
    flat = x.reshape(-1)
    if flat.dtype != jnp.float32:
        flat = flat.astype(jnp.float32)
    total = flat.shape[0]

    # Pad only to the next multiple of 128 (and only if needed) -- the partial
    # last grid block is handled by Pallas masking, not by padding rows up to
    # a tile multiple.
    pad = (-total) % LANE
    if pad:
        flat = jnp.pad(flat, (0, pad))
    rows = (total + pad) // LANE
    x2d = flat.reshape(rows, LANE)                      # lane-dense (rows, 128)

    # Scalars for SMEM.
    w2d = weight.reshape(1, 1).astype(jnp.float32)
    b2d = bias.reshape(1, 1).astype(jnp.float32)

    tile_rows = _choose_tile_rows(rows)
    grid = (pl.cdiv(rows, tile_rows),)

    y2d = pl.pallas_call(
        _linear_kernel,
        out_shape=jax.ShapeDtypeStruct((rows, LANE), jnp.float32),
        grid=grid,
        in_specs=[
            pl.BlockSpec((1, 1), lambda i: (0, 0), memory_space=pltpu.SMEM),
            pl.BlockSpec((1, 1), lambda i: (0, 0), memory_space=pltpu.SMEM),
            pl.BlockSpec((tile_rows, LANE), lambda i: (i, 0)),
        ],
        out_specs=pl.BlockSpec((tile_rows, LANE), lambda i: (i, 0)),
        compiler_params=pltpu.CompilerParams(
            dimension_semantics=("parallel",),
            vmem_limit_bytes=32 * 1024 * 1024,
        ),
    )(w2d, b2d, x2d)

    # Undo the layout plumbing: back to (N, 1).  The reshapes are metadata-only
    # on a contiguous buffer; the slice (a copy) only happens when we padded.
    y_flat = y2d.reshape(-1)
    if pad:
        y_flat = y_flat[:total]
    return y_flat.reshape(n, out_f)


if __name__ == "__main__":
    key = jax.random.PRNGKey(0)
    kx, kw, kb = jax.random.split(key, 3)

    # Shapes implied by nn.Linear(1, 1): small batch, 1 feature in / 1 out.
    N, IN_F, OUT_F = 8, 1, 1
    x = jax.random.normal(kx, (N, IN_F), dtype=jnp.float32)

    # Deterministic init mimicking torch.nn.Linear's U(-1/sqrt(in), 1/sqrt(in)).
    bound = 1.0 / (IN_F ** 0.5)
    weight = jax.random.uniform(kw, (OUT_F, IN_F), minval=-bound, maxval=bound,
                                dtype=jnp.float32)
    bias = jax.random.uniform(kb, (OUT_F,), minval=-bound, maxval=bound,
                              dtype=jnp.float32)

    y = linear_forward(x, weight, bias)
    jax.block_until_ready(y)

    # Reference check in plain JAX.
    y_ref = x @ weight.T + bias
    assert y.shape == (N, OUT_F)
    assert jnp.allclose(y, y_ref, atol=1e-6), "mismatch vs reference"

    # Padded, single-block path (N not a multiple of 128).
    N_mid = 3000
    x_mid = jax.random.normal(kx, (N_mid, IN_F), dtype=jnp.float32)
    y_mid = linear_forward(x_mid, weight, bias)
    jax.block_until_ready(y_mid)
    assert jnp.allclose(y_mid, x_mid @ weight.T + bias, atol=1e-6)

    # Multi-block tiled path with a partial (masked) last block; still tiny
    # data (~280 KiB) so the test stays fast.
    N_big = 70001
    x_big = jax.random.normal(kx, (N_big, IN_F), dtype=jnp.float32)
    y_big = linear_forward(x_big, weight, bias)
    jax.block_until_ready(y_big)
    assert jnp.allclose(y_big, x_big @ weight.T + bias, atol=1e-6)

    print("KERNEL_OK")
</pallas_src>

<mosaic_0001>
module attributes {stable_mosaic.version = 11 : i64} {
  func.func @_linear_kernel(%arg0: i32, %arg1: memref<1x1xf32, #tpu.memory_space<smem>>, %arg2: memref<1x1xf32, #tpu.memory_space<smem>>, %arg3: memref<1x128xf32, #tpu.memory_space<vmem>>, %arg4: memref<1x128xf32, #tpu.memory_space<vmem>>) attributes {dimension_semantics = [#tpu.dimension_semantics<parallel>], iteration_bounds = array<i64: 1>, scalar_prefetch = 0 : i64, scratch_operands = 0 : i64, tpu.core_type = #tpu.core_type<tc>, window_params = [{transform_indices = @transform_0, window_bounds = array<i64: 1, 1>}, {transform_indices = @transform_1, window_bounds = array<i64: 1, 1>}, {transform_indices = @transform_2, window_bounds = array<i64: 1, 128>}, {transform_indices = @transform_3, window_bounds = array<i64: 1, 128>}]} {
    %c0 = arith.constant 0 : index
    %c0_0 = arith.constant 0 : index
    %0 = memref.load %arg1[%c0, %c0_0] : memref<1x1xf32, #tpu.memory_space<smem>>
    %c0_1 = arith.constant 0 : index
    %c0_2 = arith.constant 0 : index
    %1 = memref.load %arg2[%c0_1, %c0_2] : memref<1x1xf32, #tpu.memory_space<smem>>
    %c0_3 = arith.constant 0 : index
    %c0_4 = arith.constant 0 : index
    %2 = vector.load %arg3[%c0_3, %c0_4] : memref<1x128xf32, #tpu.memory_space<vmem>>, vector<1x128xf32>
    %3 = vector.broadcast %0 : f32 to vector<1x128xf32>
    %4 = arith.mulf %2, %3 : vector<1x128xf32>
    %5 = vector.broadcast %1 : f32 to vector<1x128xf32>
    %6 = arith.addf %4, %5 : vector<1x128xf32>
    %c0_5 = arith.constant 0 : index
    %c0_6 = arith.constant 0 : index
    %7 = vector.load %arg4[%c0_5, %c0_6] : memref<1x128xf32, #tpu.memory_space<vmem>>, vector<1x128xf32>
    tpu.vector_store %arg4[%c0_5, %c0_6], %6 {strides = array<i32>} : memref<1x128xf32, #tpu.memory_space<vmem>>, vector<1x128xf32>,
    return
  }
  func.func @transform_0(%arg0: i32) -> (i32, i32) {
    %c0_i32 = arith.constant 0 : i32
    %c0_i32_0 = arith.constant 0 : i32
    %c0_i32_1 = arith.constant 0 : i32
    return %c0_i32, %c0_i32_0 : i32, i32
  }
  func.func @transform_1(%arg0: i32) -> (i32, i32) {
    %c0_i32 = arith.constant 0 : i32
    %c0_i32_0 = arith.constant 0 : i32
    %c0_i32_1 = arith.constant 0 : i32
    return %c0_i32, %c0_i32_0 : i32, i32
  }
  func.func @transform_2(%arg0: i32) -> (i32, i32) {
    %c0_i32 = arith.constant 0 : i32
    %c0_i32_0 = arith.constant 0 : i32
    return %arg0, %c0_i32 : i32, i32
  }
  func.func @transform_3(%arg0: i32) -> (i32, i32) {
    %c0_i32 = arith.constant 0 : i32
    %c0_i32_0 = arith.constant 0 : i32
    return %arg0, %c0_i32 : i32, i32
  }
}

</mosaic_0001>

<bundles_post_ra>
// kernel: tpu_custom_call.1
= control target key start
LH: loop header
LB: loop body
LE: loop exit
PB: predicated region body
PF: predicated region fallthrough
CT: control target
= control target key end

     0   :  { %s101_s0 = inlined_call_operand.<no memory space> [shape: f32[1,1], index: 0, kind: input, shape index: {}]   ;;  %s102_s1 = inlined_call_operand.<no memory space> [shape: f32[1,1], index: 1, kind: input, shape index: {}]   ;;  %s103_s2 = inlined_call_operand.vmem [shape: f32[1,128], index: 2, kind: input, shape index: {}]   ;;  %s104_s3 = inlined_call_operand.hbm [shape: f32[1,128], index: 3, kind: output, shape index: {}]  }
   0x1   :  { %v19_v0 = vld [vmem:[%s103_s2] sm:$0x1]  ;;  %v20_v1 = vstv %s101_s0  ;;  %v22_v2 = vstv %s102_s1 }
   0x2   :  { %10 = vsyncpa [#allocation5], 0  ;;  %s32_s20 = sshll.u32 %s104_s3, 4  ;;  %v21_v3 = vmul.f32 %v20_v1, %v19_v0  ;;  %s68_s21 = smov [#allocation4]   ;;  %s33_s20 = int_to_ptr.hbm [resolvable:$true] %s32_s20 }
   0x3   :  { %s30_s22 = sshll.u32 %s68_s21, 4  ;;  %s31_s22 = int_to_ptr.vmem [resolvable:$true] %s30_s22 }
   0x4   :  { %v23_v4 = vadd.f32 %v22_v2, %v21_v3 }
   0x6   :  { %24 = vst [vmem:[#allocation4] sm:$0x1] %v23_v4 }
   0x7   :  { %35 = dma.vmem_to_hbm [thread:$0]  %s31_s22, 16, %s33_s20, [#allocation5]  }
   0x8   :  { %66 = dma.done.wait [#allocation5], 16  }
   0x9   :  { %67 = vsyncadd [#allocation5], 4294967280 }
   0xa   :  { %40 = vsyncpa [#allocation5], 1 }

</bundles_post_ra>
